<compile_context>
chip_gen: v7x
topology: tpu7x:2x2x1
jax: 0.10.0
libtpu: 0.0.40
codegen_flags: <defaults>
</compile_context>

<pallas_src>
import jax
import jax.numpy as jnp
from jax.experimental import pallas as pl
from jax.experimental.pallas import tpu as pltpu


def _text_image_projection_kernel(text_ref, img_ref, wi_ref, bi_ref,
                                  wt_ref, bt_ref, img_out_ref, txt_out_ref):
    """One batch tile of TextImageProjection.

    text_ref    : (TB*S, Dt)   flattened text tokens for this batch tile
    img_ref     : (TB, Di)     image embeddings for this batch tile
    wi_ref      : (Di, num*C)  image projection weight (resident across grid)
    bi_ref      : (1, num*C)   image projection bias
    wt_ref      : (Dt, C)      text projection weight (resident across grid)
    bt_ref      : (1, C)       text projection bias
    img_out_ref : (TB, num*C)
    txt_out_ref : (TB*S, C)
    """
    # Image branch: single 2D matmul on the MXU with f32 accumulation.
    img_acc = jnp.dot(img_ref[...], wi_ref[...],
                      preferred_element_type=jnp.float32)
    img_out_ref[...] = (img_acc + bi_ref[...].astype(jnp.float32)
                        ).astype(img_out_ref.dtype)

    # Text branch: one big (TB*S, Dt) @ (Dt, C) matmul (flattened in wrapper)
    # instead of per-batch 8-row matmuls that starve the systolic array.
    txt_acc = jnp.dot(text_ref[...], wt_ref[...],
                      preferred_element_type=jnp.float32)
    txt_out_ref[...] = (txt_acc + bt_ref[...].astype(jnp.float32)
                        ).astype(txt_out_ref.dtype)


def text_image_projection(text_embeds, image_embeds, w_img, b_img, w_txt, b_txt,
                          num_image_text_embeds, *, batch_tile=None):
    """text_embeds: (B, S, Dt); image_embeds: (B, Di).
    w_img: (Di, num*C), b_img: (num*C,), w_txt: (Dt, C), b_txt: (C,).
    Weights are pre-transposed to (in, out); PyTorch Linear stores (out, in).
    Inputs may be f32 or bf16; matmuls accumulate in f32."""
    B, S, Dt = text_embeds.shape
    Di = image_embeds.shape[1]
    C = w_txt.shape[1]
    num = num_image_text_embeds
    assert w_img.shape == (Di, num * C)
    assert w_txt.shape == (Dt, C)

    out_dtype = text_embeds.dtype

    # Batch tile: largest of {8,4,2,1} that divides B (B itself if B < 8).
    if batch_tile is None:
        batch_tile = B
        for cand in (8, 4, 2, 1):
            if cand <= B and B % cand == 0:
                batch_tile = cand
                break
    TB = batch_tile
    grid = (pl.cdiv(B, TB),)

    # Flatten text to 2D in the wrapper (free layout reshape, last dim intact)
    # so the kernel never reshapes in VMEM.
    text_flat = text_embeds.reshape(B * S, Dt)
    b_img2 = b_img.reshape(1, num * C)
    b_txt2 = b_txt.reshape(1, C)

    # --- VMEM budget: resident weights + double-buffered streamed tiles. ---
    itemsize_in = jnp.dtype(text_embeds.dtype).itemsize
    itemsize_out = jnp.dtype(out_dtype).itemsize
    bytes_resident = sum(int(a.size) * a.dtype.itemsize
                         for a in (w_img, w_txt, b_img2, b_txt2))
    bytes_stream = ((TB * S * Dt + TB * Di) * itemsize_in
                    + (TB * num * C + TB * S * C) * itemsize_out)
    vmem_limit_bytes = min(64 * 1024 * 1024,
                           2 * (bytes_resident + bytes_stream) + (4 << 20))

    # --- Advisory cost estimate for the XLA scheduler. ---
    flops = 2 * B * Di * num * C + 2 * B * S * Dt * C
    bytes_accessed = (int(text_flat.size) * text_flat.dtype.itemsize
                      + int(image_embeds.size) * image_embeds.dtype.itemsize
                      + bytes_resident
                      + (B * num * C + B * S * C) * itemsize_out)

    img_out, txt_out = pl.pallas_call(
        _text_image_projection_kernel,
        out_shape=(
            jax.ShapeDtypeStruct((B, num * C), out_dtype),   # image slab
            jax.ShapeDtypeStruct((B * S, C), out_dtype),     # text slab
        ),
        grid_spec=pltpu.PrefetchScalarGridSpec(
            num_scalar_prefetch=0,
            grid=grid,
            in_specs=[
                pl.BlockSpec((TB * S, Dt), lambda i: (i, 0)),    # text (flat)
                pl.BlockSpec((TB, Di), lambda i: (i, 0)),        # image
                pl.BlockSpec((Di, num * C), lambda i: (0, 0)),   # w_img (resident)
                pl.BlockSpec((1, num * C), lambda i: (0, 0)),    # b_img (resident)
                pl.BlockSpec((Dt, C), lambda i: (0, 0)),         # w_txt (resident)
                pl.BlockSpec((1, C), lambda i: (0, 0)),          # b_txt (resident)
            ],
            out_specs=[
                pl.BlockSpec((TB, num * C), lambda i: (i, 0)),
                pl.BlockSpec((TB * S, C), lambda i: (i, 0)),
            ],
        ),
        compiler_params=pltpu.CompilerParams(
            dimension_semantics=("parallel",),   # batch axis -> shard across TCs on v7x
            vmem_limit_bytes=vmem_limit_bytes,
        ),
        cost_estimate=pl.CostEstimate(
            flops=flops, transcendentals=0, bytes_accessed=bytes_accessed),
    )(text_flat, image_embeds, w_img, b_img2, w_txt, b_txt2)

    # TODO(synk): at very large num*C on v7x (64 MiB VMEM), add an N-tiling
    # grid axis for w_img instead of keeping the full weight resident.
    image_text_embeds = img_out.reshape(B, num, C)
    text_out = txt_out.reshape(B, S, C)
    return jnp.concatenate([image_text_embeds, text_out], axis=1)


def reference(text_embeds, image_embeds, w_img, b_img, w_txt, b_txt, num):
    B = text_embeds.shape[0]
    img = image_embeds @ w_img + b_img
    img = img.reshape(B, num, -1)
    txt = jnp.einsum('bsd,dc->bsc', text_embeds, w_txt) + b_txt
    return jnp.concatenate([img, txt], axis=1)


if __name__ == "__main__":
    # Small, module-consistent shapes.
    B = 2                     # batch
    S = 8                     # text sequence length
    text_embed_dim = 64
    image_embed_dim = 32
    cross_attention_dim = 32
    num_image_text_embeds = 4

    key = jax.random.PRNGKey(0)
    k1, k2, k3, k4, k5, k6 = jax.random.split(key, 6)

    text_embeds = jax.random.normal(k1, (B, S, text_embed_dim), jnp.float32)
    image_embeds = jax.random.normal(k2, (B, image_embed_dim), jnp.float32)

    # Deterministic synthetic parameters (already transposed to (in, out)).
    w_img = jax.random.normal(
        k3, (image_embed_dim, num_image_text_embeds * cross_attention_dim),
        jnp.float32) * 0.02
    b_img = jax.random.normal(
        k4, (num_image_text_embeds * cross_attention_dim,), jnp.float32) * 0.02
    w_txt = jax.random.normal(
        k5, (text_embed_dim, cross_attention_dim), jnp.float32) * 0.02
    b_txt = jax.random.normal(k6, (cross_attention_dim,), jnp.float32) * 0.02

    out = text_image_projection(text_embeds, image_embeds, w_img, b_img,
                                w_txt, b_txt, num_image_text_embeds)
    out = jax.block_until_ready(out)

    ref = reference(text_embeds, image_embeds, w_img, b_img, w_txt, b_txt,
                    num_image_text_embeds)
    assert out.shape == (B, num_image_text_embeds + S, cross_attention_dim)
    assert out.dtype == text_embeds.dtype
    assert jnp.allclose(out, ref, atol=1e-4, rtol=1e-4)

    print("KERNEL_OK")
</pallas_src>

<mosaic_0001>
module attributes {stable_mosaic.version = 11 : i64} {
  func.func @_text_image_projection_kernel(%arg0: i32, %arg1: memref<16x64xf32, #tpu.memory_space<vmem>>, %arg2: memref<2x32xf32, #tpu.memory_space<vmem>>, %arg3: memref<32x128xf32, #tpu.memory_space<vmem>>, %arg4: memref<1x128xf32, #tpu.memory_space<vmem>>, %arg5: memref<64x32xf32, #tpu.memory_space<vmem>>, %arg6: memref<1x32xf32, #tpu.memory_space<vmem>>, %arg7: memref<2x128xf32, #tpu.memory_space<vmem>>, %arg8: memref<16x32xf32, #tpu.memory_space<vmem>>) attributes {dimension_semantics = [#tpu.dimension_semantics<parallel>], iteration_bounds = array<i64: 1>, scalar_prefetch = 0 : i64, scratch_operands = 0 : i64, tpu.core_type = #tpu.core_type<tc>, window_params = [{transform_indices = @transform_0, window_bounds = array<i64: 16, 64>}, {transform_indices = @transform_1, window_bounds = array<i64: 2, 32>}, {pipeline_mode = #tpu.pipeline_mode<synchronous>, transform_indices = @transform_2, window_bounds = array<i64: 32, 128>}, {pipeline_mode = #tpu.pipeline_mode<synchronous>, transform_indices = @transform_3, window_bounds = array<i64: 1, 128>}, {pipeline_mode = #tpu.pipeline_mode<synchronous>, transform_indices = @transform_4, window_bounds = array<i64: 64, 32>}, {pipeline_mode = #tpu.pipeline_mode<synchronous>, transform_indices = @transform_5, window_bounds = array<i64: 1, 32>}, {transform_indices = @transform_6, window_bounds = array<i64: 2, 128>}, {transform_indices = @transform_7, window_bounds = array<i64: 16, 32>}]} {
    %c0 = arith.constant 0 : index
    %c0_0 = arith.constant 0 : index
    %0 = vector.load %arg2[%c0, %c0_0] : memref<2x32xf32, #tpu.memory_space<vmem>>, vector<2x32xf32>
    %c0_1 = arith.constant 0 : index
    %c0_2 = arith.constant 0 : index
    %1 = vector.load %arg3[%c0_1, %c0_2] : memref<32x128xf32, #tpu.memory_space<vmem>>, vector<32x128xf32>
    %cst = arith.constant dense<0.000000e+00> : vector<2x128xf32>
    %2 = tpu.matmul %0, %1, %cst {dimension_numbers = #tpu.dot_dimension_numbers<[1], [0], [0], [1], [0, 0, 1, 1], [], []>} : vector<2x32xf32>, vector<32x128xf32>, vector<2x128xf32> -> vector<2x128xf32>
    %c0_3 = arith.constant 0 : index
    %c0_4 = arith.constant 0 : index
    %3 = vector.load %arg4[%c0_3, %c0_4] : memref<1x128xf32, #tpu.memory_space<vmem>>, vector<1x128xf32>
    %4 = vector.broadcast %3 : vector<1x128xf32> to vector<2x128xf32>
    %5 = arith.addf %2, %4 : vector<2x128xf32>
    %c0_5 = arith.constant 0 : index
    %c0_6 = arith.constant 0 : index
    %6 = vector.load %arg7[%c0_5, %c0_6] : memref<2x128xf32, #tpu.memory_space<vmem>>, vector<2x128xf32>
    tpu.vector_store %arg7[%c0_5, %c0_6], %5 {strides = array<i32>} : memref<2x128xf32, #tpu.memory_space<vmem>>, vector<2x128xf32>,
    %c0_7 = arith.constant 0 : index
    %c0_8 = arith.constant 0 : index
    %7 = vector.load %arg1[%c0_7, %c0_8] : memref<16x64xf32, #tpu.memory_space<vmem>>, vector<16x64xf32>
    %c0_9 = arith.constant 0 : index
    %c0_10 = arith.constant 0 : index
    %8 = vector.load %arg5[%c0_9, %c0_10] : memref<64x32xf32, #tpu.memory_space<vmem>>, vector<64x32xf32>
    %cst_11 = arith.constant dense<0.000000e+00> : vector<16x32xf32>
    %9 = tpu.matmul %7, %8, %cst_11 {dimension_numbers = #tpu.dot_dimension_numbers<[1], [0], [0], [1], [0, 0, 1, 1], [], []>} : vector<16x64xf32>, vector<64x32xf32>, vector<16x32xf32> -> vector<16x32xf32>
    %c0_12 = arith.constant 0 : index
    %c0_13 = arith.constant 0 : index
    %10 = vector.load %arg6[%c0_12, %c0_13] : memref<1x32xf32, #tpu.memory_space<vmem>>, vector<1x32xf32>
    %11 = vector.broadcast %10 : vector<1x32xf32> to vector<16x32xf32>
    %12 = arith.addf %9, %11 : vector<16x32xf32>
    %c0_14 = arith.constant 0 : index
    %c0_15 = arith.constant 0 : index
    %13 = vector.load %arg8[%c0_14, %c0_15] : memref<16x32xf32, #tpu.memory_space<vmem>>, vector<16x32xf32>
    tpu.vector_store %arg8[%c0_14, %c0_15], %12 {strides = array<i32>} : memref<16x32xf32, #tpu.memory_space<vmem>>, vector<16x32xf32>,
    return
  }
  func.func @transform_0(%arg0: i32) -> (i32, i32) {
    %c0_i32 = arith.constant 0 : i32
    %c0_i32_0 = arith.constant 0 : i32
    return %arg0, %c0_i32 : i32, i32
  }
  func.func @transform_1(%arg0: i32) -> (i32, i32) {
    %c0_i32 = arith.constant 0 : i32
    %c0_i32_0 = arith.constant 0 : i32
    return %arg0, %c0_i32 : i32, i32
  }
  func.func @transform_2(%arg0: i32) -> (i32, i32) {
    %c0_i32 = arith.constant 0 : i32
    %c0_i32_0 = arith.constant 0 : i32
    %c0_i32_1 = arith.constant 0 : i32
    return %c0_i32, %c0_i32_0 : i32, i32
  }
  func.func @transform_3(%arg0: i32) -> (i32, i32) {
    %c0_i32 = arith.constant 0 : i32
    %c0_i32_0 = arith.constant 0 : i32
    %c0_i32_1 = arith.constant 0 : i32
    return %c0_i32, %c0_i32_0 : i32, i32
  }
  func.func @transform_4(%arg0: i32) -> (i32, i32) {
    %c0_i32 = arith.constant 0 : i32
    %c0_i32_0 = arith.constant 0 : i32
    %c0_i32_1 = arith.constant 0 : i32
    return %c0_i32, %c0_i32_0 : i32, i32
  }
  func.func @transform_5(%arg0: i32) -> (i32, i32) {
    %c0_i32 = arith.constant 0 : i32
    %c0_i32_0 = arith.constant 0 : i32
    %c0_i32_1 = arith.constant 0 : i32
    return %c0_i32, %c0_i32_0 : i32, i32
  }
  func.func @transform_6(%arg0: i32) -> (i32, i32) {
    %c0_i32 = arith.constant 0 : i32
    %c0_i32_0 = arith.constant 0 : i32
    return %arg0, %c0_i32 : i32, i32
  }
  func.func @transform_7(%arg0: i32) -> (i32, i32) {
    %c0_i32 = arith.constant 0 : i32
    %c0_i32_0 = arith.constant 0 : i32
    return %arg0, %c0_i32 : i32, i32
  }
}

</mosaic_0001>

<bundles_post_ra>
// kernel: tpu_custom_call.1
= control target key start
LH: loop header
LB: loop body
LE: loop exit
PB: predicated region body
PF: predicated region fallthrough
CT: control target
= control target key end

     0   :  { %13 = vsyncpa [#allocation3], 0  ;;  %v372_v5 = vmov 0.0|0.0   ;;  %vm373_vm0 = vmmov 0   ;;  %v374_v7 = vmov 0.0   ;;  %vm131_vm1 = vcmask 523264   ;;  %s499_s0 = inlined_call_operand.vmem [shape: f32[16,64], index: 0, kind: input, shape index: {}]   ;;  %s500_s1 = inlined_call_operand.vmem [shape: f32[2,32], index: 1, kind: input, shape index: {}]   ;;  %s501_s2 = inlined_call_operand.vmem [shape: f32[32,128], index: 2, kind: input, shape index: {}]   ;;  %s502_s3 = inlined_call_operand.vmem [shape: f32[1,128], index: 3, kind: input, shape index: {}]   ;;  %s503_s4 = inlined_call_operand.vmem [shape: f32[64,32], index: 4, kind: input, shape index: {}]   ;;  %s504_s5 = inlined_call_operand.vmem [shape: f32[1,32], index: 5, kind: input, shape index: {}]   ;;  %s505_s6 = inlined_call_operand.hbm [shape: f32[2,128], index: 6, kind: output, shape index: {0}]   ;;  %s506_s7 = inlined_call_operand.hbm [shape: f32[16,32], index: 7, kind: output, shape index: {1}]  }
   0x1   :  { %v116_v0 = vld [vmem:[%s503_s4] sm:$0xff]  ;;  %v117_v1 = vld [vmem:[%s503_s4 + $0x8] sm:$0xff]  ;;  %v118_v2 = vld [vmem:[%s503_s4 + $0x10] sm:$0xff]  ;;  %295 = vmatprep.subr.bf16.mxu0 %v372_v5  ;;  %273 = vmatprep.mubr.msk.f32.mxu0 %vm373_vm0, %v374_v7 }
   0x2   :  { %v301_v3 = vpack.c.bf16 %v117_v1, %v116_v0  ;;  %v119_v4 = vld [vmem:[%s503_s4 + $0x18] sm:$0xff]  ;;  %v120_v6 = vld [vmem:[%s503_s4 + $0x20] sm:$0xff]  ;;  %v121_v9 = vld [vmem:[%s503_s4 + $0x28] sm:$0xff] }
   0x3   :  { %v305_v8 = vpack.c.bf16 %v119_v4, %v118_v2  ;;  %v28_v10 = vld [vmem:[%s501_s2] sm:$0xff]  ;;  %v29_v11 = vld [vmem:[%s501_s2 + $0x8] sm:$0xff]  ;;  %v30_v13 = vld [vmem:[%s501_s2 + $0x10] sm:$0xff]  ;;  %v309_v16 = vpack.c.bf16 %v121_v9, %v120_v6 }
   0x4   :  { %302 = vmatprep.subr.bf16.mxu1 %v301_v3  ;;  %v296_v12 = vpack.c.bf16 %v29_v11, %v28_v10  ;;  %v31_v14 = vld [vmem:[%s501_s2 + $0x18] sm:$0xff]  ;;  %v114_v15 = vld [vmem:[%s499_s0] sm:$0xff] }
   0x5   :  { %304 = vmatpush3.bf16.msra.mxu1 %v301_v3  ;;  %v299_v17 = vpack.c.bf16 %v31_v14, %v30_v13 }
   0x6   :  { %306 = vmatprep.subr.bf16.mxu1 %v305_v8  ;;  %297 = vmatpush3.bf16.msra.mxu0 %v296_v12 }
   0x7   :  { %14 = vsyncpa [#allocation5], 0  ;;  %298 = vmatprep.subr.bf16.mxu0 %v372_v5  ;;  %v122_v18 = vld [vmem:[%s503_s4 + $0x30] sm:$0xff]  ;;  %v123_v19 = vld [vmem:[%s503_s4 + $0x38] sm:$0xff]  ;;  %292 = vmatprep.mubr.msk.f32.mxu1 %vm131_vm1, %v114_v15  ;;  %vm39_vm2 = vcmask 261120   ;;  %s375_s8 = smov [#allocation2]  }
   0x8   :  { %v313_v20 = vpack.c.bf16 %v123_v19, %v122_v18  ;;  %v27_v21 = vld [vmem:[%s500_s1] sm:$0x3]  ;;  %v115_v22 = vld [vmem:[%s499_s0 + $0x8] sm:$0xff]  ;;  %s221_s9 = sshll.u32 %s375_s8, 4  ;;  %s222_s9 = int_to_ptr.vmem [resolvable:$true] %s221_s9 }
   0x9   :  { %308 = vmatpush3.bf16.msra.mxu1 %v305_v8  ;;  %v245_v23 = vld [vmem:[%s502_s3] ss:$0 sm:$0xff]  ;;  %s324_s1 = scalar_lea.vmem %s222_s9, 32  ;;  %p329_p1 = scmp.lt.s32.totalorder %s222_s9, %s222_s9 }
   0xa   :  { %310 = vmatprep.subr.bf16.mxu1 %v309_v16  ;;  %300 = vmatpush3.bf16.msra.mxu0 %v299_v17  ;;  %p325_p0 = scmp.ne.s32.totalorder %s222_s9, %s324_s1  ;;  %p330_p2 = scmp.lt.s32.totalorder %s324_s1, %s324_s1 }
   0xc   :  { %p331_p3 = por %p330_p2, %p329_p1 }
   0xd   :  { %312 = vmatpush3.bf16.msra.mxu1 %v309_v16  ;;  %274 = vmatmul.mubr.msk.f32.vlgmr.msra.gmra.mrb[0].mxu0 %vm39_vm2, %v27_v21 }
   0xe   :  { %314 = vmatprep.subr.bf16.mxu1 %v313_v20  ;;  %p332_p4 = pnand %p331_p3, %p325_p0 }
  0x11   :  { %316 = vmatpush3.bf16.msra.mxu1 %v313_v20 }
  0x14   :  { %293 = vmatmul.mubr.msk.f32.vlgmr.msra.gmra.mrb[0].mxu1 %vm131_vm1, %v115_v22 }
  0xe0   :  { %v109_v24 = vpop.f32.mrb[0].mxu0 }
  0xe1   :  { %v110_v25 = vadd.f32 %v245_v23, %v109_v24  ;;  %v275_v26 = vpop.f32.mrb[1].mxu0 }
  0xe3   :  { %113 = vst [vmem:[#allocation2] sm:$0x3] %v110_v25 }
  0xe4   :  { %335 = shalt.err (!%p332_p4)
}
  0xe5   :  { %s336_s11 = scalar_lea.hbm %s505_s6, 32 }
  0xe6   :  { %p337_p5 = scmp.ne.s32.totalorder %s505_s6, %s336_s11  ;;  %p340_p6 = scmp.lt.u32.totalorder %s336_s11, %s505_s6 }
  0xe8   :  { %p342_p7 = pnand %p340_p6, %p337_p5 }
  0xea   :  { %345 = shalt.err (!%p342_p7)
}
  0xeb   :  { %224 = dma.vmem_to_hbm [thread:$0]  %s222_s9, 32, %s505_s6, [#allocation3]   ;;  %v247_v27 = vld [vmem:[%s504_s5] ss:$0 sm:$0xff]  ;;  %v294_v28 = vpop.f32.mrb[0].mxu1 }
  0xec   :  { %s376_s19 = smov [#allocation4]   ;;  %v210_v29 = vadd.f32 %v294_v28, %v247_v27  ;;  %v204_v30 = vpop.f32.mrb[1].mxu1 }
  0xed   :  { %s230_s20 = sshll.u32 %s376_s19, 4  ;;  %v205_v31 = vadd.f32 %v247_v27, %v204_v30  ;;  %s231_s20 = int_to_ptr.vmem [resolvable:$true] %s230_s20 }
  0xee   :  { %214 = vst.msk [vmem:[#allocation4 + $0x8] sm:$0xff] %vm39_vm2, %v210_v29  ;;  %s346_s21 = scalar_lea.vmem %s231_s20, 256  ;;  %p351_p9 = scmp.lt.s32.totalorder %s231_s20, %s231_s20 }
  0xef   :  { %213 = vst.msk [vmem:[#allocation4] sm:$0xff] %vm39_vm2, %v205_v31  ;;  %p347_p8 = scmp.ne.s32.totalorder %s231_s20, %s346_s21  ;;  %p352_p10 = scmp.lt.s32.totalorder %s346_s21, %s346_s21 }
  0xf1   :  { %p353_p11 = por %p352_p10, %p351_p9 }
  0xf3   :  { %p354_p12 = pnand %p353_p11, %p347_p8 }
  0xf5   :  { %357 = shalt.err (!%p354_p12)
}
  0xf6   :  { %s358_s22 = scalar_lea.hbm %s506_s7, 256 }
  0xf7   :  { %p359_p13 = scmp.ne.s32.totalorder %s506_s7, %s358_s22  ;;  %p362_p0 = scmp.lt.u32.totalorder %s358_s22, %s506_s7 }
  0xf9   :  { %p364_p1 = pnand %p362_p0, %p359_p13 }
  0xfb   :  { %367 = shalt.err (!%p364_p1)
}
  0xfc   :  { %s377_s2 = smov 128   ;;  %s378_s27 = smov 8  }
  0xfd   :  { %236 = dma.vmem_to_hbm [thread:$0]  %s231_s20, 256, %s506_s7, [#allocation5], %s377_s2, %s377_s2, %s378_s27  }
  0xfe   :  { %368 = dma.done.wait [#allocation3], 32  }
  0xff   :  { %369 = vsyncadd [#allocation3], 4294967264 }
 0x100   :  { %370 = dma.done.wait [#allocation5], 256  }
 0x101   :  { %371 = vsyncadd [#allocation5], 4294967040 }
 0x102   :  { %243 = vsyncpa [#allocation3], 1 }
 0x103   :  { %244 = vsyncpa [#allocation5], 1 }

</bundles_post_ra>
